<compile_context>
chip_gen: v7x
topology: tpu7x:2x2x1
jax: 0.10.0
libtpu: 0.0.40
codegen_flags: <defaults>
</compile_context>

<pallas_src>
from functools import partial

import jax
import jax.numpy as jnp
from jax.experimental import pallas as pl
from jax.experimental.pallas import tpu as pltpu


def convt_kernel(w_ref, cols_ref, o_ref):
    # w_ref   : (C_out, K)   flattened, spatially-flipped weight slab (K = KH*KW*C_in)
    # cols_ref: (K, N)       im2col slab, N = B*H_out*W_out (lane-dense)
    # o_ref   : (C_out, N)   single unmasked lane-dense store
    o_ref[...] = jnp.dot(w_ref[...], cols_ref[...],
                         preferred_element_type=jnp.float32).astype(o_ref.dtype)


def prepare_weight(weight):
    """Call-invariant weight prep, done once at parameter-setup time.

    weight : (C_in, C_out, KH, KW)  PyTorch ConvTranspose2d layout
    returns: (C_out, KH*KW*C_in)    spatially-flipped, flattened slab whose K
                                    ordering ((kh,kw) major, C_in minor) matches
                                    the im2col slab built in the forward.
    """
    C_in, C_out, KH, KW = weight.shape
    w_flip = jnp.flip(weight, axis=(2, 3))                     # (C_in, C_out, KH, KW)
    return jnp.transpose(w_flip, (1, 2, 3, 0)).reshape(C_out, KH * KW * C_in)


@partial(jax.jit, static_argnames=("KH", "KW"))
def conv2d_patch_map(x, w_flat, bias, *, KH, KW):
    """ConvTranspose2d(dim, dim, kernel_size=(KH, KW), stride=(1, 1)) forward.

    x      : (B, C_in, H_in, W_in)   NCHW
    w_flat : (C_out, KH*KW*C_in)     from prepare_weight()
    bias   : (C_out,)
    returns: (B, C_out, H_in + KH - 1, W_in + KW - 1)
    """
    B, C_in, H_in, W_in = x.shape
    C_out, K = w_flat.shape
    assert K == KH * KW * C_in
    H_out = H_in + KH - 1
    W_out = W_in + KW - 1
    N = B * H_out * W_out

    # --- layout plumbing (fused by jit; cols producer fuses into the call) ---
    # "Full" zero-pad so stride-1 ConvTranspose2d == regular conv with the
    # spatially-flipped kernel.
    xp = jnp.pad(x, ((0, 0), (0, 0), (KH - 1, KH - 1), (KW - 1, KW - 1)))

    # im2col slab: k = (kh*KW + kw)*C_in + ci, n = (b*H_out + h)*W_out + w.
    taps = [xp[:, :, kh:kh + H_out, kw:kw + W_out]     # each (B, C_in, H_out, W_out)
            for kh in range(KH) for kw in range(KW)]
    cols = jnp.stack(taps, axis=0)                     # (KH*KW, B, C_in, H_out, W_out)
    cols = jnp.transpose(cols, (0, 2, 1, 3, 4))        # (KH*KW, C_in, B, H_out, W_out)
    cols = cols.reshape(K, N)

    # --- single-step Pallas call: one fused matmul, lane-dense output --------
    itemsize = jnp.dtype(x.dtype).itemsize
    out_flat = pl.pallas_call(
        convt_kernel,
        out_shape=jax.ShapeDtypeStruct((C_out, N), x.dtype),
        in_specs=[
            pl.BlockSpec(memory_space=pltpu.MemorySpace.VMEM),
            pl.BlockSpec(memory_space=pltpu.MemorySpace.VMEM),
        ],
        out_specs=pl.BlockSpec(memory_space=pltpu.MemorySpace.VMEM),
        compiler_params=pltpu.CompilerParams(
            # Allow the im2col producer to fuse into the cols operand (input 1)
            # instead of round-tripping the KH*KW-expanded slab through HBM.
            allow_input_fusion=[False, True],
        ),
        cost_estimate=pl.CostEstimate(
            flops=2 * C_out * K * N,
            transcendentals=0,
            bytes_accessed=itemsize * (C_out * K + K * N + C_out * N),
        ),
    )(w_flat, cols)

    # Bias add + fold the lane-dense (C_out, B*H*W) result back to NCHW; fuses
    # into a single epilogue op under jit.
    out = out_flat.reshape(C_out, B, H_out, W_out) + bias[:, None, None, None]
    return jnp.transpose(out, (1, 0, 2, 3))


if __name__ == "__main__":
    # Module hyper-parameters (small, consistent with the forward semantics).
    dim = 8
    patch_size = (2, 2)
    context_length = 8
    prediction_length = 8
    input_size = 8

    p1 = context_length // patch_size[0]   # 4
    p2 = input_size // patch_size[1]       # 4
    KH = prediction_length - p2 + 1        # 5
    KW = input_size - p1 + 1               # 5
    B = 2

    key = jax.random.PRNGKey(0)
    kx, kw_, kb = jax.random.split(key, 3)
    # Patch tensor fed to the transposed conv: (B, dim, p2, p1).
    x = jax.random.normal(kx, (B, dim, p2, p1), dtype=jnp.float32)
    # Deterministic synthetic parameters (PyTorch ConvTranspose2d shapes).
    weight = 0.1 * jax.random.normal(kw_, (dim, dim, KH, KW), dtype=jnp.float32)
    bias = 0.1 * jax.random.normal(kb, (dim,), dtype=jnp.float32)

    # Call-invariant weight prep, hoisted out of the forward path.
    w_flat = jax.block_until_ready(prepare_weight(weight))

    out = conv2d_patch_map(x, w_flat, bias, KH=KH, KW=KW)
    out = jax.block_until_ready(out)

    # Pure-JAX reference implementing ConvTranspose2d from its definition:
    # out[n, co, ih+kh, iw+kw] += x[n, ci, ih, iw] * W[ci, co, kh, kw]  (+ bias)
    H_out = p2 + KH - 1
    W_out = p1 + KW - 1
    ref = jnp.zeros((B, dim, H_out, W_out), jnp.float32)
    for kh in range(KH):
        for kwi in range(KW):
            ref = ref.at[:, :, kh:kh + p2, kwi:kwi + p1].add(
                jnp.einsum('nchw,co->nohw', x, weight[:, :, kh, kwi]))
    ref = ref + bias[None, :, None, None]

    assert out.shape == (B, dim, prediction_length, input_size)
    assert jnp.allclose(out, ref, atol=1e-4, rtol=1e-4), "mismatch vs reference"
    print("KERNEL_OK")
</pallas_src>

<mosaic_0001>
module attributes {stable_mosaic.version = 11 : i64} {
  func.func @convt_kernel(%arg0: memref<8x200xf32, #tpu.memory_space<vmem>>, %arg1: memref<200x128xf32, #tpu.memory_space<vmem>>, %arg2: memref<8x128xf32, #tpu.memory_space<vmem>>) attributes {dimension_semantics = [], scalar_prefetch = 0 : i64, scratch_operands = 0 : i64, tpu.core_type = #tpu.core_type<tc>} {
    %c0 = arith.constant 0 : index
    %c0_0 = arith.constant 0 : index
    %0 = vector.load %arg0[%c0, %c0_0] : memref<8x200xf32, #tpu.memory_space<vmem>>, vector<8x200xf32>
    %c0_1 = arith.constant 0 : index
    %c0_2 = arith.constant 0 : index
    %1 = vector.load %arg1[%c0_1, %c0_2] : memref<200x128xf32, #tpu.memory_space<vmem>>, vector<200x128xf32>
    %cst = arith.constant dense<0.000000e+00> : vector<8x128xf32>
    %2 = tpu.matmul %0, %1, %cst {dimension_numbers = #tpu.dot_dimension_numbers<[1], [0], [0], [1], [0, 0, 1, 1], [], []>} : vector<8x200xf32>, vector<200x128xf32>, vector<8x128xf32> -> vector<8x128xf32>
    %c0_3 = arith.constant 0 : index
    %c0_4 = arith.constant 0 : index
    %3 = vector.load %arg2[%c0_3, %c0_4] : memref<8x128xf32, #tpu.memory_space<vmem>>, vector<8x128xf32>
    tpu.vector_store %arg2[%c0_3, %c0_4], %2 {strides = array<i32>} : memref<8x128xf32, #tpu.memory_space<vmem>>, vector<8x128xf32>,
    return
  }
}

</mosaic_0001>

<bundles_post_ra>
// kernel: conv2d_patch_map.1
= control target key start
LH: loop header
LB: loop body
LE: loop exit
PB: predicated region body
PF: predicated region fallthrough
CT: control target
= control target key end

     0   :  { %v156_v0 = vmov 0.0|0.0   ;;  %vm38_vm0 = vcmask 588800   ;;  %v157_v38 = vmov 0.0   ;;  %s269_s1 = inlined_call_operand.vmem [shape: f32[200,128], index: 1, kind: input, shape index: {}]   ;;  %s270_s0 = inlined_call_operand.vmem [shape: f32[8,200], index: 0, kind: input, shape index: {}]   ;;  %s271_s2 = inlined_call_operand.vmem [shape: f32[8,128], index: 2, kind: output, shape index: {}]  }
   0x1   :  { %118 = vmatprep.subr.bf16.mxu0 %v156_v0  ;;  %v13_v1 = vld [vmem:[%s269_s1] sm:$0xff]  ;;  %v14_v2 = vld [vmem:[%s269_s1 + $0x8] sm:$0xff]  ;;  %v15_v3 = vld [vmem:[%s269_s1 + $0x10] sm:$0xff] }
   0x2   :  { %v119_v4 = vpack.c.bf16 %v14_v2, %v13_v1  ;;  %v16_v5 = vld [vmem:[%s269_s1 + $0x18] sm:$0xff]  ;;  %v17_v7 = vld [vmem:[%s269_s1 + $0x20] sm:$0xff]  ;;  %v18_v8 = vld [vmem:[%s269_s1 + $0x28] sm:$0xff] }
   0x3   :  { %v122_v6 = vpack.c.bf16 %v16_v5, %v15_v3  ;;  %v125_v9 = vpack.c.bf16 %v18_v8, %v17_v7  ;;  %v19_v10 = vld [vmem:[%s269_s1 + $0x30] sm:$0xff]  ;;  %v20_v11 = vld [vmem:[%s269_s1 + $0x38] sm:$0xff]  ;;  %v12_v12 = vld [vmem:[%s270_s0 + $0x8] sm:$0xff] }
   0x4   :  { %120 = vmatpush1.bf16.msra.mxu0 %v119_v4  ;;  %117 = vmatprep.mubr.msk.f32.mxu0 %vm38_vm0, %v12_v12  ;;  %v128_v13 = vpack.c.bf16 %v20_v11, %v19_v10  ;;  %v21_v14 = vld [vmem:[%s269_s1 + $0x40] sm:$0xff]  ;;  %v22_v15 = vld [vmem:[%s269_s1 + $0x48] sm:$0xff]  ;;  %v23_v17 = vld [vmem:[%s269_s1 + $0x50] sm:$0xff] }
   0x5   :  { %121 = vmatprep.subr.bf16.mxu0 %v156_v0  ;;  %v131_v16 = vpack.c.bf16 %v22_v15, %v21_v14  ;;  %v24_v18 = vld [vmem:[%s269_s1 + $0x58] sm:$0xff]  ;;  %v25_v20 = vld [vmem:[%s269_s1 + $0x60] sm:$0xff]  ;;  %v26_v21 = vld [vmem:[%s269_s1 + $0x68] sm:$0xff] }
   0x6   :  { %v134_v19 = vpack.c.bf16 %v24_v18, %v23_v17  ;;  %v137_v22 = vpack.c.bf16 %v26_v21, %v25_v20  ;;  %v27_v23 = vld [vmem:[%s269_s1 + $0x70] sm:$0xff]  ;;  %v28_v24 = vld [vmem:[%s269_s1 + $0x78] sm:$0xff]  ;;  %v29_v26 = vld [vmem:[%s269_s1 + $0x80] sm:$0xff] }
   0x7   :  { %v140_v25 = vpack.c.bf16 %v28_v24, %v27_v23  ;;  %v30_v27 = vld [vmem:[%s269_s1 + $0x88] sm:$0xff]  ;;  %v31_v29 = vld [vmem:[%s269_s1 + $0x90] sm:$0xff]  ;;  %v32_v30 = vld [vmem:[%s269_s1 + $0x98] sm:$0xff] }
   0x8   :  { %123 = vmatpush1.bf16.msra.mxu0 %v122_v6  ;;  %v143_v28 = vpack.c.bf16 %v30_v27, %v29_v26  ;;  %v146_v31 = vpack.c.bf16 %v32_v30, %v31_v29  ;;  %v33_v32 = vld [vmem:[%s269_s1 + $0xa0] sm:$0xff]  ;;  %v34_v33 = vld [vmem:[%s269_s1 + $0xa8] sm:$0xff]  ;;  %v35_v35 = vld [vmem:[%s269_s1 + $0xb0] sm:$0xff] }
   0x9   :  { %124 = vmatprep.subr.bf16.mxu0 %v156_v0  ;;  %v149_v34 = vpack.c.bf16 %v34_v33, %v33_v32  ;;  %v36_v36 = vld [vmem:[%s269_s1 + $0xb8] sm:$0xff]  ;;  %v37_v39 = vld [vmem:[%s269_s1 + $0xc0] sm:$0xff] }
   0xa   :  { %v152_v37 = vpack.c.bf16 %v36_v36, %v35_v35  ;;  %v11_v40 = vld [vmem:[%s270_s0] sm:$0xff] }
   0xc   :  { %126 = vmatpush1.bf16.msra.mxu0 %v125_v9 }
   0xd   :  { %127 = vmatprep.subr.bf16.mxu0 %v156_v0 }
  0x10   :  { %129 = vmatpush1.bf16.msra.mxu0 %v128_v13 }
  0x11   :  { %130 = vmatprep.subr.bf16.mxu0 %v156_v0 }
  0x14   :  { %132 = vmatpush1.bf16.msra.mxu0 %v131_v16 }
  0x15   :  { %133 = vmatprep.subr.bf16.mxu0 %v156_v0 }
  0x18   :  { %135 = vmatpush1.bf16.msra.mxu0 %v134_v19 }
  0x19   :  { %136 = vmatprep.subr.bf16.mxu0 %v156_v0 }
  0x1c   :  { %138 = vmatpush1.bf16.msra.mxu0 %v137_v22 }
  0x1d   :  { %139 = vmatprep.subr.bf16.mxu0 %v156_v0 }
  0x20   :  { %141 = vmatpush1.bf16.msra.mxu0 %v140_v25 }
  0x21   :  { %142 = vmatprep.subr.bf16.mxu0 %v156_v0 }
  0x24   :  { %144 = vmatpush1.bf16.msra.mxu0 %v143_v28 }
  0x25   :  { %145 = vmatprep.subr.bf16.mxu0 %v156_v0 }
  0x28   :  { %147 = vmatpush1.bf16.msra.mxu0 %v146_v31 }
  0x29   :  { %148 = vmatprep.subr.bf16.mxu0 %v156_v0 }
  0x2c   :  { %150 = vmatpush1.bf16.msra.mxu0 %v149_v34 }
  0x2d   :  { %151 = vmatprep.subr.bf16.mxu0 %v156_v0 }
  0x30   :  { %153 = vmatpush1.bf16.msra.mxu0 %v152_v37 }
  0x31   :  { %90 = vmatprep.subr.mxu0 %v157_v38 }
  0x34   :  { %91 = vmatpush1.msra.mxu0 %v37_v39 }
  0x35   :  { %107 = vmatmul.mubr.f32.vlgmr.msra.gmra.mrb[0].mxu0 %v11_v40 }
 0x108   :  { %v108_v41 = vpop.f32.mrb[0].mxu0 }
 0x109   :  { %112 = vst [vmem:[%s271_s2] sm:$0xff] %v108_v41  ;;  %v110_v42 = vpop.f32.mrb[1].mxu0 }

</bundles_post_ra>
